<compile_context>
chip_gen: v7x
topology: tpu7x:2x2x1
jax: 0.10.0
libtpu: 0.0.40
codegen_flags: <defaults>
</compile_context>

<pallas_src>
import jax
import jax.numpy as jnp
from jax.experimental import pallas as pl
from jax.experimental.pallas import tpu as pltpu

LANE = 128          # lane width — pad the output feature dim to this
TB_MAX = 512        # max batch tile (safe for v5e 16 MiB scoped VMEM default)


def _round_up(x, m):
    return (x + m - 1) // m * m


def qnetwork_kernel(x_ref, w1_ref, b1_ref, w2_ref, b2_ref, w3_ref, b3_ref, out_ref):
    """One batch tile of the full 3-layer MLP forward pass.

    x_ref: (TB, S) f32; w*: bf16 (in, out); b*: (1, out) f32; out_ref: (TB, 128) f32.
    bf16 operands feed the MXU at full rate; accumulation is f32.
    """
    x = x_ref[...]                                                    # (TB, S) f32
    h1 = jnp.dot(x.astype(jnp.bfloat16), w1_ref[...],
                 preferred_element_type=jnp.float32) + b1_ref[...]
    h1 = jnp.maximum(h1, 0.0)                                         # ReLU in f32
    h2 = jnp.dot(h1.astype(jnp.bfloat16), w2_ref[...],
                 preferred_element_type=jnp.float32) + b2_ref[...]
    h2 = jnp.maximum(h2, 0.0)                                         # ReLU in f32
    out = jnp.dot(h2.astype(jnp.bfloat16), w3_ref[...],
                  preferred_element_type=jnp.float32) + b3_ref[...]
    out_ref[...] = out                                                # (TB, 128) f32


def qnetwork_forward(state, params):
    """state: (B, state_size) f32; params: w1,b1,w2,b2,w3,b3 (w* bf16, b* f32)."""
    w1, b1, w2, b2, w3, b3 = (params[k] for k in ("w1", "b1", "w2", "b2", "w3", "b3"))
    B, S = state.shape
    H1 = w1.shape[1]
    H2 = w2.shape[1]
    A = w3.shape[1]

    # ---- lane-dense output: pad action dim to a multiple of 128 ----
    A_pad = _round_up(A, LANE)
    w3p = jnp.pad(w3, ((0, 0), (0, A_pad - A)))
    b3p = jnp.pad(b3, ((0, 0), (0, A_pad - A)))

    # ---- batch tiling: grid over batch, weights resident across steps ----
    TB = min(TB_MAX, _round_up(B, 8))
    B_pad = _round_up(_round_up(B, 8), TB)
    x = jnp.pad(state, ((0, B_pad - B), (0, 0)))
    grid = (B_pad // TB,)

    out = pl.pallas_call(
        qnetwork_kernel,
        out_shape=jax.ShapeDtypeStruct((B_pad, A_pad), jnp.float32),
        grid=grid,
        in_specs=[
            pl.BlockSpec((TB, S), lambda i: (i, 0)),       # activations: tiled over batch
            pl.BlockSpec((S, H1), lambda i: (0, 0)),       # weights/biases: resident
            pl.BlockSpec((1, H1), lambda i: (0, 0)),
            pl.BlockSpec((H1, H2), lambda i: (0, 0)),
            pl.BlockSpec((1, H2), lambda i: (0, 0)),
            pl.BlockSpec((H2, A_pad), lambda i: (0, 0)),
            pl.BlockSpec((1, A_pad), lambda i: (0, 0)),
        ],
        out_specs=pl.BlockSpec((TB, A_pad), lambda i: (i, 0)),
        compiler_params=pltpu.CompilerParams(
            dimension_semantics=("parallel",),             # shard batch across TCs (v7x)
        ),
    )(x, w1, b1, w2, b2, w3p, b3p)

    return out[:B, :A]


def init_qnetwork_params(key, state_size, action_size, fc1_units=128, fc2_units=128):
    """torch.nn.Linear-style init U(-1/sqrt(fan_in), +1/sqrt(fan_in)).

    Weights stored as (in_features, out_features) in bf16 (MXU operands);
    biases stored as (1, out_features) in f32 (VPU epilogue).
    """
    def linear(k, fan_in, fan_out):
        kw, kb = jax.random.split(k)
        bound = 1.0 / jnp.sqrt(jnp.float32(fan_in))
        w = jax.random.uniform(kw, (fan_in, fan_out), jnp.float32, -bound, bound)
        b = jax.random.uniform(kb, (1, fan_out), jnp.float32, -bound, bound)
        return w.astype(jnp.bfloat16), b

    k1, k2, k3 = jax.random.split(key, 3)
    w1, b1 = linear(k1, state_size, fc1_units)
    w2, b2 = linear(k2, fc1_units, fc2_units)
    w3, b3 = linear(k3, fc2_units, action_size)
    return {"w1": w1, "b1": b1, "w2": w2, "b2": b2, "w3": w3, "b3": b3}


if __name__ == "__main__":
    key = jax.random.PRNGKey(0)
    k_params, k_state = jax.random.split(key)

    B, state_size, action_size = 8, 8, 4
    params = init_qnetwork_params(k_params, state_size, action_size,
                                  fc1_units=128, fc2_units=128)
    state = jax.random.normal(k_state, (B, state_size), jnp.float32)

    out = qnetwork_forward(state, params)
    out = jax.block_until_ready(out)
    assert out.shape == (B, action_size)

    # Reference 1: same mixed-precision math (bf16 MXU operands, f32 accumulate).
    def ref_mixed(x, p):
        h1 = jnp.maximum(jnp.dot(x.astype(jnp.bfloat16), p["w1"],
                                 preferred_element_type=jnp.float32) + p["b1"], 0.0)
        h2 = jnp.maximum(jnp.dot(h1.astype(jnp.bfloat16), p["w2"],
                                 preferred_element_type=jnp.float32) + p["b2"], 0.0)
        return jnp.dot(h2.astype(jnp.bfloat16), p["w3"],
                       preferred_element_type=jnp.float32) + p["b3"]

    ref_m = ref_mixed(state, params)
    assert jnp.allclose(out, ref_m, atol=1e-2, rtol=1e-2)

    # Reference 2: pure-f32 semantics of the original torch module (looser tol for bf16).
    w1f, w2f, w3f = (params[k].astype(jnp.float32) for k in ("w1", "w2", "w3"))
    h1 = jnp.maximum(state @ w1f + params["b1"], 0.0)
    h2 = jnp.maximum(h1 @ w2f + params["b2"], 0.0)
    ref_f32 = h2 @ w3f + params["b3"]
    assert jnp.allclose(out, ref_f32, atol=5e-2, rtol=5e-2)

    print("KERNEL_OK")
</pallas_src>

<mosaic_0001>
module attributes {stable_mosaic.version = 11 : i64} {
  func.func @qnetwork_kernel(%arg0: i32, %arg1: memref<8x8xf32, #tpu.memory_space<vmem>>, %arg2: memref<8x128xbf16, #tpu.memory_space<vmem>>, %arg3: memref<1x128xf32, #tpu.memory_space<vmem>>, %arg4: memref<128x128xbf16, #tpu.memory_space<vmem>>, %arg5: memref<1x128xf32, #tpu.memory_space<vmem>>, %arg6: memref<128x128xbf16, #tpu.memory_space<vmem>>, %arg7: memref<1x128xf32, #tpu.memory_space<vmem>>, %arg8: memref<8x128xf32, #tpu.memory_space<vmem>>) attributes {dimension_semantics = [#tpu.dimension_semantics<parallel>], iteration_bounds = array<i64: 1>, scalar_prefetch = 0 : i64, scratch_operands = 0 : i64, tpu.core_type = #tpu.core_type<tc>, window_params = [{transform_indices = @transform_0, window_bounds = array<i64: 8, 8>}, {pipeline_mode = #tpu.pipeline_mode<synchronous>, transform_indices = @transform_1, window_bounds = array<i64: 8, 128>}, {pipeline_mode = #tpu.pipeline_mode<synchronous>, transform_indices = @transform_2, window_bounds = array<i64: 1, 128>}, {pipeline_mode = #tpu.pipeline_mode<synchronous>, transform_indices = @transform_3, window_bounds = array<i64: 128, 128>}, {pipeline_mode = #tpu.pipeline_mode<synchronous>, transform_indices = @transform_4, window_bounds = array<i64: 1, 128>}, {pipeline_mode = #tpu.pipeline_mode<synchronous>, transform_indices = @transform_5, window_bounds = array<i64: 128, 128>}, {pipeline_mode = #tpu.pipeline_mode<synchronous>, transform_indices = @transform_6, window_bounds = array<i64: 1, 128>}, {transform_indices = @transform_7, window_bounds = array<i64: 8, 128>}]} {
    %c0 = arith.constant 0 : index
    %c0_0 = arith.constant 0 : index
    %0 = vector.load %arg1[%c0, %c0_0] : memref<8x8xf32, #tpu.memory_space<vmem>>, vector<8x8xf32>
    %1 = arith.truncf %0 : vector<8x8xf32> to vector<8x8xbf16>
    %c0_1 = arith.constant 0 : index
    %c0_2 = arith.constant 0 : index
    %2 = vector.load %arg2[%c0_1, %c0_2] : memref<8x128xbf16, #tpu.memory_space<vmem>>, vector<8x128xbf16>
    %cst = arith.constant dense<0.000000e+00> : vector<8x128xf32>
    %3 = tpu.matmul %1, %2, %cst {dimension_numbers = #tpu.dot_dimension_numbers<[1], [0], [0], [1], [0, 0, 1, 1], [], []>} : vector<8x8xbf16>, vector<8x128xbf16>, vector<8x128xf32> -> vector<8x128xf32>
    %c0_3 = arith.constant 0 : index
    %c0_4 = arith.constant 0 : index
    %4 = vector.load %arg3[%c0_3, %c0_4] : memref<1x128xf32, #tpu.memory_space<vmem>>, vector<1x128xf32>
    %5 = vector.broadcast %4 : vector<1x128xf32> to vector<8x128xf32>
    %6 = arith.addf %3, %5 : vector<8x128xf32>
    %cst_5 = arith.constant 0.000000e+00 : f32
    %7 = vector.broadcast %cst_5 : f32 to vector<8x128xf32>
    %8 = arith.maximumf %6, %7 : vector<8x128xf32>
    %9 = arith.truncf %8 : vector<8x128xf32> to vector<8x128xbf16>
    %c0_6 = arith.constant 0 : index
    %c0_7 = arith.constant 0 : index
    %10 = vector.load %arg4[%c0_6, %c0_7] : memref<128x128xbf16, #tpu.memory_space<vmem>>, vector<128x128xbf16>
    %cst_8 = arith.constant dense<0.000000e+00> : vector<8x128xf32>
    %11 = tpu.matmul %9, %10, %cst_8 {dimension_numbers = #tpu.dot_dimension_numbers<[1], [0], [0], [1], [0, 0, 1, 1], [], []>} : vector<8x128xbf16>, vector<128x128xbf16>, vector<8x128xf32> -> vector<8x128xf32>
    %c0_9 = arith.constant 0 : index
    %c0_10 = arith.constant 0 : index
    %12 = vector.load %arg5[%c0_9, %c0_10] : memref<1x128xf32, #tpu.memory_space<vmem>>, vector<1x128xf32>
    %13 = vector.broadcast %12 : vector<1x128xf32> to vector<8x128xf32>
    %14 = arith.addf %11, %13 : vector<8x128xf32>
    %cst_11 = arith.constant 0.000000e+00 : f32
    %15 = vector.broadcast %cst_11 : f32 to vector<8x128xf32>
    %16 = arith.maximumf %14, %15 : vector<8x128xf32>
    %17 = arith.truncf %16 : vector<8x128xf32> to vector<8x128xbf16>
    %c0_12 = arith.constant 0 : index
    %c0_13 = arith.constant 0 : index
    %18 = vector.load %arg6[%c0_12, %c0_13] : memref<128x128xbf16, #tpu.memory_space<vmem>>, vector<128x128xbf16>
    %cst_14 = arith.constant dense<0.000000e+00> : vector<8x128xf32>
    %19 = tpu.matmul %17, %18, %cst_14 {dimension_numbers = #tpu.dot_dimension_numbers<[1], [0], [0], [1], [0, 0, 1, 1], [], []>} : vector<8x128xbf16>, vector<128x128xbf16>, vector<8x128xf32> -> vector<8x128xf32>
    %c0_15 = arith.constant 0 : index
    %c0_16 = arith.constant 0 : index
    %20 = vector.load %arg7[%c0_15, %c0_16] : memref<1x128xf32, #tpu.memory_space<vmem>>, vector<1x128xf32>
    %21 = vector.broadcast %20 : vector<1x128xf32> to vector<8x128xf32>
    %22 = arith.addf %19, %21 : vector<8x128xf32>
    %c0_17 = arith.constant 0 : index
    %c0_18 = arith.constant 0 : index
    %23 = vector.load %arg8[%c0_17, %c0_18] : memref<8x128xf32, #tpu.memory_space<vmem>>, vector<8x128xf32>
    tpu.vector_store %arg8[%c0_17, %c0_18], %22 {strides = array<i32>} : memref<8x128xf32, #tpu.memory_space<vmem>>, vector<8x128xf32>,
    return
  }
  func.func @transform_0(%arg0: i32) -> (i32, i32) {
    %c0_i32 = arith.constant 0 : i32
    %c0_i32_0 = arith.constant 0 : i32
    return %arg0, %c0_i32 : i32, i32
  }
  func.func @transform_1(%arg0: i32) -> (i32, i32) {
    %c0_i32 = arith.constant 0 : i32
    %c0_i32_0 = arith.constant 0 : i32
    %c0_i32_1 = arith.constant 0 : i32
    return %c0_i32, %c0_i32_0 : i32, i32
  }
  func.func @transform_2(%arg0: i32) -> (i32, i32) {
    %c0_i32 = arith.constant 0 : i32
    %c0_i32_0 = arith.constant 0 : i32
    %c0_i32_1 = arith.constant 0 : i32
    return %c0_i32, %c0_i32_0 : i32, i32
  }
  func.func @transform_3(%arg0: i32) -> (i32, i32) {
    %c0_i32 = arith.constant 0 : i32
    %c0_i32_0 = arith.constant 0 : i32
    %c0_i32_1 = arith.constant 0 : i32
    return %c0_i32, %c0_i32_0 : i32, i32
  }
  func.func @transform_4(%arg0: i32) -> (i32, i32) {
    %c0_i32 = arith.constant 0 : i32
    %c0_i32_0 = arith.constant 0 : i32
    %c0_i32_1 = arith.constant 0 : i32
    return %c0_i32, %c0_i32_0 : i32, i32
  }
  func.func @transform_5(%arg0: i32) -> (i32, i32) {
    %c0_i32 = arith.constant 0 : i32
    %c0_i32_0 = arith.constant 0 : i32
    %c0_i32_1 = arith.constant 0 : i32
    return %c0_i32, %c0_i32_0 : i32, i32
  }
  func.func @transform_6(%arg0: i32) -> (i32, i32) {
    %c0_i32 = arith.constant 0 : i32
    %c0_i32_0 = arith.constant 0 : i32
    %c0_i32_1 = arith.constant 0 : i32
    return %c0_i32, %c0_i32_0 : i32, i32
  }
  func.func @transform_7(%arg0: i32) -> (i32, i32) {
    %c0_i32 = arith.constant 0 : i32
    %c0_i32_0 = arith.constant 0 : i32
    return %arg0, %c0_i32 : i32, i32
  }
}

</mosaic_0001>

<bundles_post_ra>
// kernel: tpu_custom_call.1
= control target key start
LH: loop header
LB: loop body
LE: loop exit
PB: predicated region body
PF: predicated region fallthrough
CT: control target
= control target key end

     0   :  { %12 = vsyncpa [#allocation3], 0  ;;  %s751_s0 = inlined_call_operand.hbm [shape: f32[8,8], index: 0, kind: input, shape index: {}]   ;;  %s752_s1 = inlined_call_operand.hbm [shape: bf16[8,128], index: 1, kind: input, shape index: {}]   ;;  %s753_s2 = inlined_call_operand.vmem [shape: f32[1,128], index: 2, kind: input, shape index: {}]   ;;  %s754_s3 = inlined_call_operand.hbm [shape: bf16[128,128], index: 3, kind: input, shape index: {}]   ;;  %s755_s4 = inlined_call_operand.vmem [shape: f32[1,128], index: 4, kind: input, shape index: {}]   ;;  %s756_s5 = inlined_call_operand.hbm [shape: bf16[128,128], index: 5, kind: input, shape index: {}]   ;;  %s757_s6 = inlined_call_operand.vmem [shape: f32[1,128], index: 6, kind: input, shape index: {}]   ;;  %s758_s7 = inlined_call_operand.hbm [shape: f32[8,128], index: 7, kind: output, shape index: {}]  }
   0x1   :  { %13 = vsyncpa [#allocation6], 0 }
   0x2   :  { %14 = vsyncpa [#allocation9], 0 }
   0x3   :  { %15 = vsyncpa [#allocation4], 0  ;;  %s610_s24 = smov [#allocation5]   ;;  %s611_s26 = smov [#allocation2]  }
   0x4   :  { %s32_s25 = sshll.u32 %s610_s24, 4  ;;  %s22_s27 = sshll.u32 %s611_s26, 4  ;;  %s33_s25 = int_to_ptr.vmem [resolvable:$true] %s32_s25  ;;  %s23_s27 = int_to_ptr.vmem [resolvable:$true] %s22_s27 }
   0x5   :  { %s492_s30 = scalar_lea.hbm %s752_s1, 64 }
   0x6   :  { %p493_p0 = scmp.ne.s32.totalorder %s752_s1, %s492_s30  ;;  %p496_p1 = scmp.lt.u32.totalorder %s492_s30, %s752_s1 }
   0x8   :  { %p498_p2 = pnand %p496_p1, %p493_p0 }
   0xa   :  { %501 = shalt.err (!%p498_p2)
}
   0xb   :  { %s502_s12 = scalar_lea.vmem %s33_s25, 64  ;;  %p507_p4 = scmp.lt.s32.totalorder %s33_s25, %s33_s25 }
   0xc   :  { %p503_p3 = scmp.ne.s32.totalorder %s33_s25, %s502_s12  ;;  %p508_p5 = scmp.lt.s32.totalorder %s502_s12, %s502_s12 }
   0xe   :  { %p509_p6 = por %p508_p5, %p507_p4 }
  0x10   :  { %p510_p7 = pnand %p509_p6, %p503_p3 }
  0x12   :  { %513 = shalt.err (!%p510_p7)
}
  0x13   :  { %35 = dma.hbm_to_vmem [thread:$0]  %s752_s1, 64, %s33_s25, [#allocation6]  }
  0x14   :  { %s514_s17 = scalar_lea.hbm %s751_s0, 128 }
  0x15   :  { %p515_p8 = scmp.ne.s32.totalorder %s751_s0, %s514_s17  ;;  %p518_p9 = scmp.lt.u32.totalorder %s514_s17, %s751_s0 }
  0x17   :  { %p520_p10 = pnand %p518_p9, %p515_p8 }
  0x19   :  { %523 = shalt.err (!%p520_p10)
}
  0x1a   :  { %s524_s22 = scalar_lea.vmem %s23_s27, 128  ;;  %p529_p12 = scmp.lt.s32.totalorder %s23_s27, %s23_s27 }
  0x1b   :  { %p525_p11 = scmp.ne.s32.totalorder %s23_s27, %s524_s22  ;;  %p530_p13 = scmp.lt.s32.totalorder %s524_s22, %s524_s22 }
  0x1d   :  { %p531_p0 = por %p530_p13, %p529_p12 }
  0x1f   :  { %p532_p1 = pnand %p531_p0, %p525_p11 }
  0x21   :  { %535 = shalt.err (!%p532_p1)
}
  0x22   :  { %25 = dma.hbm_to_vmem [thread:$0]  %s751_s0, 128, %s23_s27, [#allocation3]  }
  0x23   :  { %s612_s24 = smov [#allocation7]   ;;  %s536_s29 = scalar_lea.hbm %s754_s3, 1024 }
  0x24   :  { %s43_s25 = sshll.u32 %s612_s24, 4  ;;  %p537_p2 = scmp.ne.s32.totalorder %s754_s3, %s536_s29  ;;  %s44_s25 = int_to_ptr.vmem [resolvable:$true] %s43_s25 }
  0x25   :  { %p540_p3 = scmp.lt.u32.totalorder %s536_s29, %s754_s3 }
  0x27   :  { %p542_p4 = pnand %p540_p3, %p537_p2 }
  0x29   :  { %545 = shalt.err (!%p542_p4)
}
  0x2a   :  { %s546_s11 = scalar_lea.vmem %s44_s25, 1024  ;;  %p551_p6 = scmp.lt.s32.totalorder %s44_s25, %s44_s25 }
  0x2b   :  { %p547_p5 = scmp.ne.s32.totalorder %s44_s25, %s546_s11  ;;  %p552_p7 = scmp.lt.s32.totalorder %s546_s11, %s546_s11 }
  0x2d   :  { %p553_p8 = por %p552_p7, %p551_p6 }
  0x2f   :  { %p554_p9 = pnand %p553_p8, %p547_p5 }
  0x31   :  { %557 = shalt.err (!%p554_p9)
}
  0x32   :  { %s613_s0 = smov 64   ;;  %s614_s27 = smov 4  }
  0x33   :  { %49 = dma.hbm_to_vmem [thread:$0]  %s754_s3, 1024, %s44_s25, [#allocation6], %s613_s0, %s613_s0, %s614_s27  }
  0x34   :  { %s615_s14 = smov [#allocation8]   ;;  %s558_s18 = scalar_lea.hbm %s756_s5, 1024 }
  0x35   :  { %s57_s15 = sshll.u32 %s615_s14, 4  ;;  %p559_p10 = scmp.ne.s32.totalorder %s756_s5, %s558_s18  ;;  %s58_s15 = int_to_ptr.vmem [resolvable:$true] %s57_s15 }
  0x36   :  { %p562_p11 = scmp.lt.u32.totalorder %s558_s18, %s756_s5 }
  0x38   :  { %p564_p12 = pnand %p562_p11, %p559_p10 }
  0x3a   :  { %567 = shalt.err (!%p564_p12)
}
  0x3b   :  { %s568_s1 = scalar_lea.vmem %s58_s15, 1024  ;;  %p573_p0 = scmp.lt.s32.totalorder %s58_s15, %s58_s15 }
  0x3c   :  { %p569_p13 = scmp.ne.s32.totalorder %s58_s15, %s568_s1  ;;  %p574_p1 = scmp.lt.s32.totalorder %s568_s1, %s568_s1 }
  0x3e   :  { %p575_p2 = por %p574_p1, %p573_p0 }
  0x40   :  { %p576_p3 = pnand %p575_p2, %p569_p13 }
  0x42   :  { %579 = shalt.err (!%p576_p3)
}
  0x43   :  { %63 = dma.hbm_to_vmem [thread:$0]  %s756_s5, 1024, %s58_s15, [#allocation9], %s613_s0, %s613_s0, %s614_s27  }
  0x44   :  { %602 = dma.done.wait [#allocation3], 128  }
  0x45   :  { %603 = vsyncadd [#allocation3], 4294967168 }
  0x46   :  { %604 = dma.done.wait [#allocation6], 1088  }
  0x47   :  { %605 = vsyncadd [#allocation6], 4294966208 }
  0x48   :  { %606 = dma.done.wait [#allocation9], 1024  }
  0x49   :  { %607 = vsyncadd [#allocation9], 4294966272  ;;  %v616_v0 = vmov 0.0   ;;  %vm617_vm0 = vmmov 0   ;;  %vm93_vm1 = vcmask 1043456   ;;  %v79_v2 = vld [vmem:[#allocation2] sm:$0xff] }
  0x4a   :  { %421 = vmatprep.subr.bf16.mxu0 %v616_v0  ;;  %423 = vmatprep.mubr.msk.bf16.mxu0 %vm617_vm0, %v616_v0  ;;  %v81_v1 = vld [vmem:[#allocation5] sm:$0xf]  ;;  %v80_v4 = vpack.c.bf16 %v79_v2, %v79_v2  ;;  %v476_v5 = vld [vmem:[#allocation7] sm:$0xff]   ;;  %vm89_vm2 = vcmask 64512   ;;  %v477_v6 = vld [vmem:[#allocation7 + $0x8] sm:$0xff]   ;;  %s618_s29 = smov [#allocation10]  }
  0x4b   :  { %427 = vmatprep.subr.bf16.mxu1 %v616_v0  ;;  %443 = vmatprep.mubr.msk.bf16.mxu1 %vm617_vm0, %v616_v0  ;;  %v95_v3 = vsel %vm93_vm1, %v81_v1, 0  ;;  %v478_v7 = vld [vmem:[#allocation7 + $0x10] sm:$0xff]   ;;  %v479_v8 = vld [vmem:[#allocation7 + $0x18] sm:$0xff]   ;;  %v480_v9 = vld [vmem:[#allocation7 + $0x20] sm:$0xff]   ;;  %s370_s30 = sshll.u32 %s618_s29, 4  ;;  %s371_s30 = int_to_ptr.vmem [resolvable:$true] %s370_s30 }
  0x4c   :  { %422 = vmatpush3.bf16.msra.mxu0 %v95_v3  ;;  %428 = vmatpush3.bf16.msra.mxu1 %v476_v5  ;;  %v481_v10 = vld [vmem:[#allocation7 + $0x28] sm:$0xff]   ;;  %v482_v11 = vld [vmem:[#allocation7 + $0x30] sm:$0xff]   ;;  %v483_v12 = vld [vmem:[#allocation7 + $0x38] sm:$0xff]   ;;  %p585_p5 = scmp.lt.s32.totalorder %s371_s30, %s371_s30 }
  0x4d   :  { %447 = vmatprep.subr.bf16.mxu0 %v616_v0  ;;  %429 = vmatprep.subr.bf16.mxu1 %v616_v0  ;;  %v484_v13 = vld [vmem:[#allocation8] sm:$0xff]   ;;  %v485_v14 = vld [vmem:[#allocation8 + $0x8] sm:$0xff]   ;;  %v486_v15 = vld [vmem:[#allocation8 + $0x10] sm:$0xff]  }
  0x4e   :  { %v487_v16 = vld [vmem:[#allocation8 + $0x18] sm:$0xff]   ;;  %v488_v17 = vld [vmem:[#allocation8 + $0x20] sm:$0xff]   ;;  %v489_v18 = vld [vmem:[#allocation8 + $0x28] sm:$0xff]  }
  0x4f   :  { %424 = vmatmul.mubr.msk.bf16.vlgmr.msra.gmra.mrb[0].mxu0 %vm89_vm2, %v80_v4  ;;  %v381_v19 = vld [vmem:[%s753_s2] ss:$0 sm:$0xff]  ;;  %v491_v28 = vld [vmem:[#allocation8 + $0x38] sm:$0xff]  }
  0x50   :  { %463 = vmatprep.mubr.msk.bf16.mxu0 %vm617_vm0, %v616_v0  ;;  %430 = vmatpush3.bf16.msra.mxu1 %v477_v6  ;;  %v490_v27 = vld [vmem:[#allocation8 + $0x30] sm:$0xff]  }
  0x51   :  { %431 = vmatprep.subr.bf16.mxu1 %v616_v0  ;;  %448 = vmatpush3.bf16.msra.mxu0 %v484_v13  ;;  %v383_v29 = vld [vmem:[%s755_s4] ss:$0 sm:$0xff]  ;;  %s580_s4 = scalar_lea.vmem %s371_s30, 128 }
  0x52   :  { %449 = vmatprep.subr.bf16.mxu0 %v616_v0  ;;  %v392_v37 = vld [vmem:[%s757_s6] ss:$0 sm:$0xff]  ;;  %p581_p4 = scmp.ne.s32.totalorder %s371_s30, %s580_s4  ;;  %p586_p6 = scmp.lt.s32.totalorder %s580_s4, %s580_s4 }
  0x54   :  { %432 = vmatpush3.bf16.msra.mxu1 %v478_v7  ;;  %p587_p7 = por %p586_p6, %p585_p5 }
  0x55   :  { %433 = vmatprep.subr.bf16.mxu1 %v616_v0  ;;  %450 = vmatpush3.bf16.msra.mxu0 %v485_v14 }
  0x56   :  { %451 = vmatprep.subr.bf16.mxu0 %v616_v0  ;;  %p588_p8 = pnand %p587_p7, %p581_p4 }
  0x58   :  { %434 = vmatpush3.bf16.msra.mxu1 %v479_v8 }
  0x59   :  { %435 = vmatprep.subr.bf16.mxu1 %v616_v0  ;;  %452 = vmatpush3.bf16.msra.mxu0 %v486_v15 }
  0x5a   :  { %453 = vmatprep.subr.bf16.mxu0 %v616_v0 }
  0x5c   :  { %436 = vmatpush3.bf16.msra.mxu1 %v480_v9 }
  0x5d   :  { %437 = vmatprep.subr.bf16.mxu1 %v616_v0  ;;  %454 = vmatpush3.bf16.msra.mxu0 %v487_v16 }
  0x5e   :  { %455 = vmatprep.subr.bf16.mxu0 %v616_v0 }
  0x60   :  { %438 = vmatpush3.bf16.msra.mxu1 %v481_v10 }
  0x61   :  { %439 = vmatprep.subr.bf16.mxu1 %v616_v0  ;;  %456 = vmatpush3.bf16.msra.mxu0 %v488_v17 }
  0x62   :  { %457 = vmatprep.subr.bf16.mxu0 %v616_v0 }
  0x64   :  { %440 = vmatpush3.bf16.msra.mxu1 %v482_v11 }
  0x65   :  { %441 = vmatprep.subr.bf16.mxu1 %v616_v0  ;;  %458 = vmatpush3.bf16.msra.mxu0 %v489_v18 }
  0x66   :  { %459 = vmatprep.subr.bf16.mxu0 %v616_v0 }
  0x68   :  { %442 = vmatpush3.bf16.msra.mxu1 %v483_v12 }
  0x69   :  { %460 = vmatpush3.bf16.msra.mxu0 %v490_v27 }
  0x6a   :  { %461 = vmatprep.subr.bf16.mxu0 %v616_v0 }
  0x6d   :  { %462 = vmatpush3.bf16.msra.mxu0 %v491_v28 }
 0x122   :  { %v131_v20 = vpop.f32.mrb[0].mxu0 }
 0x123   :  { %v132_v21 = vadd.f32 %v381_v19, %v131_v20  ;;  %v425_v22 = vpop.f32.mrb[1].mxu0 }
 0x124   :  { %v134_v23 = vpop.f32.mrb[2].mxu0 }
 0x125   :  { %v137_v24 = vmax.f32 %v132_v21, 0.0  ;;  %v426_v25 = vpop.f32.mrb[3].mxu0 }
 0x127   :  { %v138_v26 = vpack.c.bf16 %v137_v24, %v137_v24 }
 0x129   :  { %444 = vmatmul.mubr.bf16.vlgmr.msra.gmra.mrb[0].mxu1 %v138_v26 }
 0x1fc   :  { %v244_v30 = vpop.f32.mrb[0].mxu1 }
 0x1fd   :  { %v245_v31 = vadd.f32 %v383_v29, %v244_v30  ;;  %v445_v32 = vpop.f32.mrb[1].mxu1 }
 0x1fe   :  { %v247_v33 = vpop.f32.mrb[2].mxu1 }
 0x1ff   :  { %v250_v34 = vmax.f32 %v245_v31, 0.0  ;;  %v446_v35 = vpop.f32.mrb[3].mxu1 }
 0x201   :  { %v251_v36 = vpack.c.bf16 %v250_v34, %v250_v34 }
 0x203   :  { %464 = vmatmul.mubr.bf16.vlgmr.msra.gmra.mrb[4].mxu0 %v251_v36 }
 0x2d6   :  { %v357_v38 = vpop.f32.mrb[4].mxu0 }
 0x2d7   :  { %v358_v39 = vadd.f32 %v392_v37, %v357_v38  ;;  %v465_v40 = vpop.f32.mrb[5].mxu0 }
 0x2d8   :  { %v360_v41 = vpop.f32.mrb[6].mxu0 }
 0x2d9   :  { %363 = vst [vmem:[#allocation10] sm:$0xff] %v358_v39  ;;  %v466_v42 = vpop.f32.mrb[7].mxu0 }
 0x2da   :  { %591 = shalt.err (!%p588_p8)
}
 0x2db   :  { %s592_s6 = scalar_lea.hbm %s758_s7, 128 }
 0x2dc   :  { %p593_p9 = scmp.ne.s32.totalorder %s758_s7, %s592_s6  ;;  %p596_p10 = scmp.lt.u32.totalorder %s592_s6, %s758_s7 }
 0x2de   :  { %p598_p11 = pnand %p596_p10, %p593_p9 }
 0x2e0   :  { %601 = shalt.err (!%p598_p11)
}
 0x2e1   :  { %373 = dma.vmem_to_hbm [thread:$0]  %s371_s30, 128, %s758_s7, [#allocation4]  }
 0x2e2   :  { %608 = dma.done.wait [#allocation4], 128  }
 0x2e3   :  { %609 = vsyncadd [#allocation4], 4294967168 }
 0x2e4   :  { %377 = vsyncpa [#allocation3], 1 }
 0x2e5   :  { %378 = vsyncpa [#allocation6], 1 }
 0x2e6   :  { %379 = vsyncpa [#allocation9], 1 }
 0x2e7   :  { %380 = vsyncpa [#allocation4], 1 }

</bundles_post_ra>
